<compile_context>
chip_gen: v7x
topology: tpu7x:2x2x1
jax: 0.10.0
libtpu: 0.0.40
codegen_flags: <defaults>
</compile_context>

<pallas_src>
import functools

import jax
import jax.numpy as jnp
from jax import lax
from jax.experimental import pallas as pl
from jax.experimental.pallas import tpu as pltpu


def _round_up(x, m):
    return ((x + m - 1) // m) * m


def _vmem_capacity_bytes():
    """Per-core VMEM capacity (generation-aware), with a conservative fallback."""
    try:
        cap = getattr(pltpu.get_tpu_info(), "vmem_capacity_bytes", None)
        if cap:
            return int(cap)
    except Exception:
        pass
    return 64 << 20  # v7x per-TensorCore VMEM; safe lower bound for v5e/v6e too.


def _ffn_kernel_resident(x_ref, w1_ref, b1_ref, w2_ref, b2_ref, o_ref, *,
                         compute_dtype):
    """relu(x @ W1^T + b1) @ W2^T + b2 with W1/W2 fully VMEM-resident.

    x_ref  : (tile_rows, d_model)  input dtype (cast to compute dtype in-kernel)
    w1_ref : (d_ff, d_model)       compute dtype, PyTorch nn.Linear layout
    b1_ref : (1, d_ff)             f32
    w2_ref : (d_model, d_ff)       compute dtype, PyTorch nn.Linear layout
    b2_ref : (1, d_model)          f32
    o_ref  : (tile_rows, d_model)  output dtype
    """
    x = x_ref[...].astype(compute_dtype)  # cheap VPU cast, hidden under the MXU
    h = lax.dot_general(
        x, w1_ref[...],
        dimension_numbers=(((1,), (1,)), ((), ())),
        preferred_element_type=jnp.float32,
    )                                                  # (tile_rows, d_ff) f32
    h = jnp.maximum(h + b1_ref[...], 0.0)              # bias + ReLU in f32
    # TODO(synk): training-mode dropout (p=0.1) omitted; eval-mode dropout is identity.
    out = lax.dot_general(
        h.astype(compute_dtype), w2_ref[...],
        dimension_numbers=(((1,), (1,)), ((), ())),
        preferred_element_type=jnp.float32,
    )                                                  # (tile_rows, d_model) f32
    o_ref[...] = (out + b2_ref[...]).astype(o_ref.dtype)


def _ffn_kernel_tiled(x_ref, w1_ref, b1_ref, w2_ref, b2_ref, o_ref, acc_ref, *,
                      compute_dtype):
    """One (row-tile, d_ff-tile) step with an f32 accumulator over the d_ff axis."""
    k = pl.program_id(1)

    @pl.when(k == 0)
    def _():
        acc_ref[...] = jnp.zeros_like(acc_ref)

    x = x_ref[...].astype(compute_dtype)
    h = lax.dot_general(
        x, w1_ref[...],
        dimension_numbers=(((1,), (1,)), ((), ())),
        preferred_element_type=jnp.float32,
    )                                                  # (tile_rows, tile_ff) f32
    h = jnp.maximum(h + b1_ref[...], 0.0)
    # TODO(synk): training-mode dropout (p=0.1) omitted; eval-mode dropout is identity.
    acc_ref[...] += lax.dot_general(
        h.astype(compute_dtype), w2_ref[...],
        dimension_numbers=(((1,), (1,)), ((), ())),
        preferred_element_type=jnp.float32,
    )                                                  # (tile_rows, d_model) f32

    @pl.when(k == pl.num_programs(1) - 1)
    def _():
        o_ref[...] = (acc_ref[...] + b2_ref[...]).astype(o_ref.dtype)


@functools.partial(jax.jit,
                   static_argnames=("tile_rows", "tile_ff", "compute_dtype"))
def position_wise_feed_forward(x, w1, b1, w2, b2, *,
                               tile_rows=None, tile_ff=None,
                               compute_dtype=None):
    """x: (B, S, d_model).
    w1: (d_ff, d_model), b1: (d_ff,), w2: (d_model, d_ff), b2: (d_model,)
    (PyTorch nn.Linear layout; weights are NOT transposed on the host).
    compute_dtype: MXU operand dtype; defaults to bf16.  Accumulation and the
    bias/ReLU epilogue always run in f32; the output keeps x.dtype."""
    B, S, d_model = x.shape
    d_ff = w1.shape[0]
    out_dtype = x.dtype
    compute_dtype = jnp.dtype(jnp.bfloat16 if compute_dtype is None
                              else compute_dtype)
    cds = compute_dtype.itemsize
    xds = jnp.dtype(x.dtype).itemsize
    ods = jnp.dtype(out_dtype).itemsize

    n_rows = B * S
    row_align = 8 if (xds >= 4 and ods >= 4) else 16

    # Generation-aware VMEM budget (v5e/v6e: 128 MiB, v7x: 64 MiB per core).
    vmem_cap = _vmem_capacity_bytes()
    budget = int(vmem_cap * 0.75)

    def footprint(t_rows, t_ff, with_acc):
        wgt = 2 * 2 * t_ff * d_model * cds              # W1 + W2 blocks, double-buffered
        bias = 2 * (t_ff + d_model) * 4                 # f32 biases, double-buffered
        xio = 2 * t_rows * d_model * (xds + ods)        # x / out tiles, double-buffered
        scr = t_rows * d_model * 4 if with_acc else 0   # f32 accumulator scratch
        hbuf = t_rows * t_ff * 4                        # f32 intermediate activation
        return wgt + bias + xio + scr + hbuf

    # Decide: weights fully VMEM-resident (one HBM fetch per call) vs. tiled
    # d_ff (weights re-streamed per row tile).
    if tile_ff is not None:
        weights_resident = tile_ff >= d_ff
        tile_ff = min(tile_ff, d_ff)
    else:
        weights_resident = footprint(256, d_ff, with_acc=False) <= budget

    # Row tiling: 256 rows fill the MXU M dim when weights are resident; when
    # weights are re-streamed, taller tiles (~512) raise arithmetic intensity
    # past the HBM roofline.  Prefer >= 2 row tiles (shrink instead of padding
    # to one tile) so v7x's two TensorCores both get work on the parallel axis.
    if tile_rows is None:
        target = 256 if weights_resident else 512
        tile_rows = min(target, _round_up(n_rows, row_align))
        if n_rows > row_align and _round_up(n_rows, tile_rows) // tile_rows < 2:
            tile_rows = max(row_align, _round_up((n_rows + 1) // 2, row_align))
    tile_rows = max(row_align, _round_up(tile_rows, row_align))

    # d_ff tiling: largest 128-multiple divisor of d_ff whose footprint fits
    # the per-core VMEM budget.
    if tile_ff is None:
        if weights_resident:
            tile_ff = d_ff
        else:
            cands = sorted((t for t in range(128, d_ff, 128) if d_ff % t == 0),
                           reverse=True)
            tile_ff = None
            for t in cands:
                if footprint(tile_rows, t, with_acc=True) <= budget:
                    tile_ff = t
                    break
            if tile_ff is None:
                # No divisor fits: smallest legal tile (correctness over perf),
                # or full residency if d_ff has no 128-multiple divisor at all.
                tile_ff = cands[-1] if cands else d_ff
    if d_ff % tile_ff != 0:
        tile_ff = d_ff  # block shapes must tile d_ff exactly
    n_ff_tiles = d_ff // tile_ff

    n_rows_pad = _round_up(n_rows, tile_rows)
    n_row_tiles = n_rows_pad // tile_rows

    # Activations stay in their original dtype (in-kernel downcast); only pad
    # the row dimension.  Weight casts are no-ops if weights are already bf16.
    x2 = x.reshape(n_rows, d_model)
    if n_rows_pad != n_rows:
        x2 = jnp.pad(x2, ((0, n_rows_pad - n_rows), (0, 0)))
    w1c = w1.astype(compute_dtype)
    w2c = w2.astype(compute_dtype)
    b1_2d = b1.reshape(1, d_ff).astype(jnp.float32)
    b2_2d = b2.reshape(1, d_model).astype(jnp.float32)

    # Always set the scoped VMEM limit from the estimate (v5e default is only
    # ~16 MiB) and clamp it below the physical per-core VMEM (64 MiB on v7x).
    est = footprint(tile_rows, tile_ff, with_acc=(n_ff_tiles > 1))
    vmem_limit = int(min(max(2 * est + (8 << 20), 32 << 20),
                         int(vmem_cap * 0.9)))

    if n_ff_tiles == 1:
        # Fast path: W1/W2 fully resident, no accumulator, no zero-init.
        kernel = functools.partial(_ffn_kernel_resident,
                                   compute_dtype=compute_dtype)
        grid_spec = pltpu.PrefetchScalarGridSpec(
            num_scalar_prefetch=0,
            grid=(n_row_tiles,),
            in_specs=[
                pl.BlockSpec((tile_rows, d_model), lambda i: (i, 0)),  # x
                pl.BlockSpec((d_ff, d_model), lambda i: (0, 0)),       # W1 (resident)
                pl.BlockSpec((1, d_ff), lambda i: (0, 0)),             # b1
                pl.BlockSpec((d_model, d_ff), lambda i: (0, 0)),       # W2 (resident)
                pl.BlockSpec((1, d_model), lambda i: (0, 0)),          # b2
            ],
            out_specs=pl.BlockSpec((tile_rows, d_model), lambda i: (i, 0)),
            scratch_shapes=[],
        )
        dim_sem = ("parallel",)
    else:
        kernel = functools.partial(_ffn_kernel_tiled,
                                   compute_dtype=compute_dtype)
        grid_spec = pltpu.PrefetchScalarGridSpec(
            num_scalar_prefetch=0,
            grid=(n_row_tiles, n_ff_tiles),
            in_specs=[
                pl.BlockSpec((tile_rows, d_model), lambda i, k: (i, 0)),  # x
                pl.BlockSpec((tile_ff, d_model), lambda i, k: (k, 0)),    # W1
                pl.BlockSpec((1, tile_ff), lambda i, k: (0, k)),          # b1
                pl.BlockSpec((d_model, tile_ff), lambda i, k: (0, k)),    # W2
                pl.BlockSpec((1, d_model), lambda i, k: (0, 0)),          # b2
            ],
            out_specs=pl.BlockSpec((tile_rows, d_model), lambda i, k: (i, 0)),
            scratch_shapes=[pltpu.VMEM((tile_rows, d_model), jnp.float32)],
        )
        dim_sem = ("parallel", "arbitrary")

    out2 = pl.pallas_call(
        kernel,
        out_shape=jax.ShapeDtypeStruct((n_rows_pad, d_model), out_dtype),
        grid_spec=grid_spec,
        compiler_params=pltpu.CompilerParams(
            dimension_semantics=dim_sem,
            vmem_limit_bytes=vmem_limit),
    )(x2, w1c, b1_2d, w2c, b2_2d)

    return out2[:n_rows].reshape(B, S, d_model)


def _init_linear(key, out_features, in_features, dtype=jnp.float32):
    """Deterministic init mimicking PyTorch nn.Linear (uniform +-1/sqrt(fan_in))."""
    kw, kb = jax.random.split(key)
    bound = 1.0 / jnp.sqrt(in_features)
    w = jax.random.uniform(kw, (out_features, in_features), dtype,
                           minval=-bound, maxval=bound)
    b = jax.random.uniform(kb, (out_features,), dtype,
                           minval=-bound, maxval=bound)
    return w, b


if __name__ == "__main__":
    key = jax.random.PRNGKey(0)
    k_x, k_w1, k_w2, k_x2, k_w3, k_w4 = jax.random.split(key, 6)

    # Case 1: small FFN -> resident-weights fast path, default bf16 MXU operands.
    B, S, d_model, d_ff = 2, 8, 32, 64
    x = jax.random.normal(k_x, (B, S, d_model), dtype=jnp.float32)
    w1, b1 = _init_linear(k_w1, d_ff, d_model)      # nn.Linear(d_model, d_ff)
    w2, b2 = _init_linear(k_w2, d_model, d_ff)      # nn.Linear(d_ff, d_model)
    ref = jnp.maximum(x @ w1.T + b1, 0.0) @ w2.T + b2   # eval-mode dropout = identity

    out = jax.block_until_ready(position_wise_feed_forward(x, w1, b1, w2, b2))
    assert out.shape == (B, S, d_model)
    assert jnp.allclose(out, ref, atol=5e-2, rtol=5e-2)   # bf16 MXU operands

    out_f32 = jax.block_until_ready(
        position_wise_feed_forward(x, w1, b1, w2, b2, compute_dtype=jnp.float32))
    assert jnp.allclose(out_f32, ref, atol=1e-5, rtol=1e-5)  # exact f32 path

    # Case 2: force the tiled-d_ff accumulator path (f32 compute -> exact).
    d_model2, d_ff2 = 128, 256
    x2 = jax.random.normal(k_x2, (B, S, d_model2), dtype=jnp.float32)
    w3, b3 = _init_linear(k_w3, d_ff2, d_model2)
    w4, b4 = _init_linear(k_w4, d_model2, d_ff2)
    ref2 = jnp.maximum(x2 @ w3.T + b3, 0.0) @ w4.T + b4
    out2 = jax.block_until_ready(
        position_wise_feed_forward(x2, w3, b3, w4, b4,
                                   tile_ff=128, compute_dtype=jnp.float32))
    assert out2.shape == (B, S, d_model2)
    assert jnp.allclose(out2, ref2, atol=1e-4, rtol=1e-4)

    print("KERNEL_OK")
</pallas_src>

<mosaic_0001>
module attributes {stable_mosaic.version = 11 : i64} {
  func.func @_ffn_kernel_resident(%arg0: i32, %arg1: memref<8x32xf32, #tpu.memory_space<vmem>>, %arg2: memref<64x32xbf16, #tpu.memory_space<vmem>>, %arg3: memref<1x64xf32, #tpu.memory_space<vmem>>, %arg4: memref<32x64xbf16, #tpu.memory_space<vmem>>, %arg5: memref<1x32xf32, #tpu.memory_space<vmem>>, %arg6: memref<8x32xf32, #tpu.memory_space<vmem>>) attributes {dimension_semantics = [#tpu.dimension_semantics<parallel>], iteration_bounds = array<i64: 2>, scalar_prefetch = 0 : i64, scratch_operands = 0 : i64, tpu.core_type = #tpu.core_type<tc>, window_params = [{transform_indices = @transform_0, window_bounds = array<i64: 8, 32>}, {pipeline_mode = #tpu.pipeline_mode<synchronous>, transform_indices = @transform_1, window_bounds = array<i64: 64, 32>}, {pipeline_mode = #tpu.pipeline_mode<synchronous>, transform_indices = @transform_2, window_bounds = array<i64: 1, 64>}, {pipeline_mode = #tpu.pipeline_mode<synchronous>, transform_indices = @transform_3, window_bounds = array<i64: 32, 64>}, {pipeline_mode = #tpu.pipeline_mode<synchronous>, transform_indices = @transform_4, window_bounds = array<i64: 1, 32>}, {transform_indices = @transform_5, window_bounds = array<i64: 8, 32>}]} {
    %c0 = arith.constant 0 : index
    %c0_0 = arith.constant 0 : index
    %0 = vector.load %arg1[%c0, %c0_0] : memref<8x32xf32, #tpu.memory_space<vmem>>, vector<8x32xf32>
    %1 = arith.truncf %0 : vector<8x32xf32> to vector<8x32xbf16>
    %c0_1 = arith.constant 0 : index
    %c0_2 = arith.constant 0 : index
    %2 = vector.load %arg2[%c0_1, %c0_2] : memref<64x32xbf16, #tpu.memory_space<vmem>>, vector<64x32xbf16>
    %cst = arith.constant dense<0.000000e+00> : vector<8x64xf32>
    %3 = tpu.matmul %1, %2, %cst {dimension_numbers = #tpu.dot_dimension_numbers<[1], [1], [0], [0], [0, 0, 1, 0], [], []>} : vector<8x32xbf16>, vector<64x32xbf16>, vector<8x64xf32> -> vector<8x64xf32>
    %c0_3 = arith.constant 0 : index
    %c0_4 = arith.constant 0 : index
    %4 = vector.load %arg3[%c0_3, %c0_4] : memref<1x64xf32, #tpu.memory_space<vmem>>, vector<1x64xf32>
    %5 = vector.broadcast %4 : vector<1x64xf32> to vector<8x64xf32>
    %6 = arith.addf %3, %5 : vector<8x64xf32>
    %cst_5 = arith.constant 0.000000e+00 : f32
    %7 = vector.broadcast %cst_5 : f32 to vector<8x64xf32>
    %8 = arith.maximumf %6, %7 : vector<8x64xf32>
    %9 = arith.truncf %8 : vector<8x64xf32> to vector<8x64xbf16>
    %c0_6 = arith.constant 0 : index
    %c0_7 = arith.constant 0 : index
    %10 = vector.load %arg4[%c0_6, %c0_7] : memref<32x64xbf16, #tpu.memory_space<vmem>>, vector<32x64xbf16>
    %cst_8 = arith.constant dense<0.000000e+00> : vector<8x32xf32>
    %11 = tpu.matmul %9, %10, %cst_8 {dimension_numbers = #tpu.dot_dimension_numbers<[1], [1], [0], [0], [0, 0, 1, 0], [], []>} : vector<8x64xbf16>, vector<32x64xbf16>, vector<8x32xf32> -> vector<8x32xf32>
    %c0_9 = arith.constant 0 : index
    %c0_10 = arith.constant 0 : index
    %12 = vector.load %arg5[%c0_9, %c0_10] : memref<1x32xf32, #tpu.memory_space<vmem>>, vector<1x32xf32>
    %13 = vector.broadcast %12 : vector<1x32xf32> to vector<8x32xf32>
    %14 = arith.addf %11, %13 : vector<8x32xf32>
    %c0_11 = arith.constant 0 : index
    %c0_12 = arith.constant 0 : index
    %15 = vector.load %arg6[%c0_11, %c0_12] : memref<8x32xf32, #tpu.memory_space<vmem>>, vector<8x32xf32>
    tpu.vector_store %arg6[%c0_11, %c0_12], %14 {strides = array<i32>} : memref<8x32xf32, #tpu.memory_space<vmem>>, vector<8x32xf32>,
    return
  }
  func.func @transform_0(%arg0: i32) -> (i32, i32) {
    %c0_i32 = arith.constant 0 : i32
    %c0_i32_0 = arith.constant 0 : i32
    return %arg0, %c0_i32 : i32, i32
  }
  func.func @transform_1(%arg0: i32) -> (i32, i32) {
    %c0_i32 = arith.constant 0 : i32
    %c0_i32_0 = arith.constant 0 : i32
    %c0_i32_1 = arith.constant 0 : i32
    return %c0_i32, %c0_i32_0 : i32, i32
  }
  func.func @transform_2(%arg0: i32) -> (i32, i32) {
    %c0_i32 = arith.constant 0 : i32
    %c0_i32_0 = arith.constant 0 : i32
    %c0_i32_1 = arith.constant 0 : i32
    return %c0_i32, %c0_i32_0 : i32, i32
  }
  func.func @transform_3(%arg0: i32) -> (i32, i32) {
    %c0_i32 = arith.constant 0 : i32
    %c0_i32_0 = arith.constant 0 : i32
    %c0_i32_1 = arith.constant 0 : i32
    return %c0_i32, %c0_i32_0 : i32, i32
  }
  func.func @transform_4(%arg0: i32) -> (i32, i32) {
    %c0_i32 = arith.constant 0 : i32
    %c0_i32_0 = arith.constant 0 : i32
    %c0_i32_1 = arith.constant 0 : i32
    return %c0_i32, %c0_i32_0 : i32, i32
  }
  func.func @transform_5(%arg0: i32) -> (i32, i32) {
    %c0_i32 = arith.constant 0 : i32
    %c0_i32_0 = arith.constant 0 : i32
    return %arg0, %c0_i32 : i32, i32
  }
}

</mosaic_0001>

<bundles_post_ra>
// kernel: position_wise_feed_forward.1
= control target key start
LH: loop header
LB: loop body
LE: loop exit
PB: predicated region body
PF: predicated region fallthrough
CT: control target
= control target key end

     0   :  { %10 = vsyncpa [#allocation3], 0  ;;  %s786_s0 = inlined_call_operand.vmem [shape: f32[16,32], index: 0, kind: input, shape index: {}]   ;;  %s787_s1 = inlined_call_operand.vmem [shape: bf16[64,32], index: 1, kind: input, shape index: {}]   ;;  %s788_s2 = inlined_call_operand.vmem [shape: f32[1,64], index: 2, kind: input, shape index: {}]   ;;  %s789_s3 = inlined_call_operand.vmem [shape: bf16[32,64], index: 3, kind: input, shape index: {}]   ;;  %s790_s4 = inlined_call_operand.vmem [shape: f32[1,32], index: 4, kind: input, shape index: {}]   ;;  %s791_s5 = inlined_call_operand.hbm [shape: f32[16,32], index: 5, kind: output, shape index: {}]  }
   0x1   :  { %12 = vsyncpa [#allocation3 + $0x1], 0  ;;  %s653_s18 = smov 0   ;;  %s655_s19 = smov 0  }
   0x2   :  { %s657_s20 = smov 0   ;;  %s659_s21 = smov 0  }
   0x3 LB: > { %s674_s22 = sadd.s32 4294967295, %s618_s21   ;;  %s461_s23 = sadd.s32 4294967294, %s618_s21   ;;  %s618_s21 = sphi %s659_s21, %s797_s21   ;;  %s614_s20 = sphi %s657_s20, %s796_s20   ;;  %s610_s19 = sphi %s655_s19, %s795_s19   ;;  %s606_s18 = sphi %s653_s18, %s794_s18  }
   0x4   : > { %s678_s24 = sadd.s32 1, %s618_s21   ;;  %s135_s25 = sadd.s32 1, %s614_s20 }
   0x5   : > { %s132_s26 = ssub.s32 %s618_s21, %s678_s24  ;;  %p145_p0 = scmp.ne.s32.totalorder %s614_s20, %s610_s19 }
   0x6   : > { %p133_p1 = scmp.eq.s32.totalorder %s132_s26, 0  ;;  %p146_p2 = scmp.eq.s32.totalorder %s674_s22, 1 }
   0x7   : > { %p151_p3 = scmp.ne.s32.totalorder %s610_s19, %s606_s18  ;;  %p152_p4 = scmp.eq.s32.totalorder %s461_s23, 1 }
   0x8   : > { %s689_s27 = scalar_select %p133_p1, %s614_s20, %s135_s25  }
   0x9   : > { %p691_p5 = por %p146_p2, %p145_p0  ;;  %p695_p6 = por %p152_p4, %p151_p3 }
   0xa   : > { %p464_p7 = scmp.ge.s32.totalorder %s618_s21, 1  ;;  %p189_p8 = scmp.lt.s32.totalorder %s618_s21, 3 }
   0xc   : > { %p190_p9 = pnand %p464_p7, %p189_p8 }
   0xd   : > { %v550_v0 = vld [vmem:[%s787_s1] sm:$0xff] (!%p190_p9)   ;;  %v620_v1 = vmov (!%p190_p9), 0.0   ;;  %vm258_vm0 = vcmask (!%p190_p9), 261120   ;;  %v551_v3 = vld [vmem:[%s787_s1 + $0x8] sm:$0xff] (!%p190_p9)   ;;  %vm621_vm1 = vmmov (!%p190_p9), 0   ;;  %vm337_vm2 = vcmask (!%p190_p9), 523264  }
   0xe   : > { %193 = sbr.rel (%p190_p9) target bundleno = 492 (0x1ec), region = 40  ;;  %489 = vmatprep.subr.bf16.mxu0 (!%p190_p9), %v620_v1  ;;  %501 = vmatprep.subr.bf16.mxu1 (!%p190_p9), %v620_v1  ;;  %v263_v2 = vsel (!%p190_p9), %vm258_vm0, %v550_v0, 0  ;;  %v554_v4 = vld [vmem:[%s789_s3] sm:$0xff] (!%p190_p9)   ;;  %v266_v6 = vsel (!%p190_p9), %vm258_vm0, %v551_v3, 0  ;;  %v552_v7 = vld [vmem:[%s787_s1 + $0x10] sm:$0xff] (!%p190_p9)   ;;  %p216_p10 = scmp.lt.s32.totalorder (!%p190_p9), %s674_s22, 1 }
   0xf   : > { %490 = vmatpush3.bf16.xpose.msra.mxu0 (!%p190_p9), %v263_v2  ;;  %497 = vmatprep.mubr.msk.bf16.mxu0 (!%p190_p9), %vm621_vm1, %v620_v1  ;;  %v342_v5 = vsel (!%p190_p9), %vm337_vm2, %v554_v4, 0  ;;  %v269_v8 = vsel (!%p190_p9), %vm258_vm0, %v552_v7, 0  ;;  %v553_v9 = vld [vmem:[%s787_s1 + $0x18] sm:$0xff] (!%p190_p9)   ;;  %v555_v13 = vld [vmem:[%s789_s3 + $0x8] sm:$0xff] (!%p190_p9)   ;;  %v467_v15 = vld [vmem:[%s788_s2] ss:$0 sm:$0xff] (!%p190_p9) }
  0x10   : > { %491 = vmatprep.subr.bf16.mxu0 (!%p190_p9), %v620_v1  ;;  %505 = vmatprep.mubr.msk.bf16.mxu1 (!%p190_p9), %vm621_vm1, %v620_v1  ;;  %v272_v10 = vsel (!%p190_p9), %vm258_vm0, %v553_v9, 0  ;;  %v345_v14 = vsel (!%p190_p9), %vm337_vm2, %v555_v13, 0  ;;  %s213_s8 = sand.u32 (!%p190_p9), 1, %s610_s19   ;;  %v473_v23 = vld [vmem:[%s790_s4] ss:$0 sm:$0xff] (!%p190_p9)  ;;  %s478_s12 = sshll.u32 (!%p190_p9), %s674_s22, 7 }
  0x11   : > { %502 = vmatpush3.bf16.xpose.msra.mxu1 (!%p190_p9), %v342_v5  ;;  %s465_s9 = sshll.u32 (!%p190_p9), %s213_s8, 3  ;;  %s743_s17 = scalar_lea.hbm (!%p190_p9), %s791_s5, %s478_s12 }
  0x12   : > { %503 = vmatprep.subr.bf16.mxu1 (!%p190_p9), %v620_v1 }
  0x15   : > { %s217_s13 = scalar_select %p216_p10, %s674_s22, 1 }
  0x16   : > { %s389_s22 = scalar_lea.sflag [#allocation3], %s213_s8 }
  0x17   : > { %492 = vmatpush3.bf16.xpose.msra.mxu0 %v266_v6  ;;  %s466_s16 = sshll.u32 %s217_s13, 3  ;;  %s215_s13 = scalar_lea.vmem [#allocation2], %s465_s9 }
  0x18   : > { %493 = vmatprep.subr.bf16.mxu0 %v620_v1  ;;  %s219_s25 = scalar_lea.vmem %s786_s0, %s466_s16  ;;  %s402_s14 = sshll.u32 %s215_s13, 4  ;;  %s745_s14 = int_to_ptr.vmem [resolvable:$true] %s402_s14 }
  0x19   : > { %v221_v11 = vld [vmem:[%s219_s25] sm:$0xff]  ;;  %504 = vmatpush3.bf16.xpose.msra.mxu1 %v345_v14  ;;  %s556_s23 = scalar_lea.vmem %s745_s14, 128  ;;  %s622_s25 = smov [#allocation2]  }
  0x1a   : > { %v222_v12 = vpack.c.bf16 %v221_v11, %v221_v11  ;;  %p557_p11 = scmp.ne.s32.totalorder %s745_s14, %s556_s23  ;;  %s560_s26 = sshll.u32 %s622_s25, 4  ;;  %s561_s26 = int_to_ptr.vmem [resolvable:$false] %s560_s26 }
  0x1b   : > { %s562_s30 = scalar_lea.vmem %s561_s26, 256  ;;  %p563_p0 = scmp.lt.s32.totalorder %s745_s14, %s561_s26 }
  0x1c   : > { %p558_p12 = pnand %p557_p11, %p691_p5  ;;  %p564_p1 = scmp.lt.s32.totalorder %s562_s30, %s556_s23 }
  0x1e   : > { %p559_p13 = pneg %p558_p12  ;;  %p565_p2 = por %p564_p1, %p563_p0 }
  0x1f   : > { %494 = vmatpush3.bf16.xpose.msra.mxu0 %v269_v8 }
  0x20   : > { %495 = vmatprep.subr.bf16.mxu0 %v620_v1  ;;  %p566_p3 = pnand %p565_p2, %p559_p13 }
  0x27   : > { %496 = vmatpush3.bf16.xpose.msra.mxu0 %v272_v10 }
  0x2e   : > { %498 = vmatmul.mubr.msk.bf16.vlgmr.msra.gmra.mrb[0].mxu0 %vm258_vm0, %v222_v12 }
 0x101   : > { %v308_v16 = vpop.f32.mrb[0].mxu0 }
 0x102   : > { %v309_v17 = vadd.f32 %v467_v15, %v308_v16  ;;  %v499_v18 = vpop.f32.mrb[1].mxu0 }
 0x103   : > { %v311_v19 = vpop.f32.mrb[2].mxu0 }
 0x104   : > { %v314_v20 = vmax.f32 %v309_v17, 0.0  ;;  %v500_v21 = vpop.f32.mrb[3].mxu0 }
 0x106   : > { %v315_v22 = vpack.c.bf16 %v314_v20, %v314_v20 }
 0x108   : > { %506 = vmatmul.mubr.msk.bf16.vlgmr.msra.gmra.mrb[0].mxu1 %vm337_vm2, %v315_v22 }
 0x1db   : > { %v381_v24 = vpop.f32.mrb[0].mxu1 }
 0x1dc   : > { %v382_v25 = vadd.f32 %v473_v23, %v381_v24  ;;  %v507_v26 = vpop.f32.mrb[1].mxu1 }
 0x1dd   : > { %v384_v27 = vpop.f32.mrb[2].mxu1 }
 0x1de   : > { %v508_v28 = vpop.f32.mrb[3].mxu1  ;;  %387 = vst.msk [vmem:[%s215_s13] sm:$0xff] %vm258_vm0, %v382_v25 }
 0x1df   : > { %569 = shalt.err (!%p566_p3)
}
 0x1e0   : > { %s570_s6 = scalar_lea.hbm %s743_s17, 128  ;;  %s574_s9 = scalar_lea.hbm %s791_s5, 256 }
 0x1e1   : > { %p571_p4 = scmp.ne.s32.totalorder %s743_s17, %s570_s6  ;;  %p575_p9 = scmp.lt.u32.totalorder %s743_s17, %s791_s5 }
 0x1e2   : > { %p576_p10 = scmp.lt.u32.totalorder %s574_s9, %s570_s6  ;;  %p578_p12 = scmp.lt.u32.totalorder %s570_s6, %s743_s17 }
 0x1e3   : > { %p572_p7 = pnand %p571_p4, %p691_p5 }
 0x1e4   : > { %p577_p11 = por %p576_p10, %p575_p9 }
 0x1e5   : > { %p573_p8 = pneg %p572_p7 }
 0x1e6   : > { %p579_p13 = por %p578_p12, %p577_p11 }
 0x1e8   : > { %p580_p0 = pnand %p579_p13, %p573_p8 }
 0x1ea   : > { %583 = shalt.err (!%p580_p0)
}
 0x1eb   : > { %509 = dma.vmem_to_hbm [thread:$0]  (%p691_p5), %s745_s14, 128, %s743_s17, %s389_s22  }
 0x1ec PF: > { %p515_p1 = scmp.ge.s32.totalorder %s618_s21, 2  ;;  %s414_s12 = sand.u32 1, %s606_s18  }
 0x1ed   : > { %s415_s13 = scalar_lea.sflag [#allocation3], %s414_s12 }
 0x1ee   : > { %p512_p2 = pnand %p515_p1, %p695_p6 }
 0x1f0   : > { %601 = dma.done.wait (!%p512_p2), %s415_s13, 128  }
 0x1f1   : > { %603 = vsyncadd (!%p512_p2), %s415_s13, 4294967168  ;;  %p15_p3 = scmp.ge.s32.totalorder %s678_s24, 4   ;;  %s794_s18 = smov %s610_s19 }
 0x1f2   : > { %s795_s19 = smov %s614_s20  ;;  %s796_s20 = smov %s689_s27 }
 0x1f3   : > { %s797_s21 = smov %s678_s24  ;;  %17 = sbr.rel (!%p15_p3) target bundleno = 3 (0x3), region = 75 }
 0x1fa   :  { %420 = vsyncpa [#allocation3], 1 }
 0x1fb   :  { %422 = vsyncpa [#allocation3 + $0x1], 1 }

</bundles_post_ra>
